<compile_context>
chip_gen: v7x
topology: tpu7x:2x2x1
jax: 0.10.0
libtpu: 0.0.40
codegen_flags: <defaults>
</compile_context>

<pallas_src>
import functools

import jax
import jax.numpy as jnp
from jax.experimental import pallas as pl
from jax.experimental.pallas import tpu as pltpu


def _round_up(x, m):
    return (x + m - 1) // m * m


def _vmem_capacity_bytes():
    try:
        info = pltpu.get_tpu_info()
        for name in ("vmem_capacity_bytes", "vmem_bytes", "vmem_size_bytes"):
            cap = getattr(info, name, None)
            if cap:
                return int(cap)
    except Exception:
        pass
    return 64 * 1024 * 1024      # conservative (v7x); v5e/v6e have 128 MiB


def _agru_kernel(facts_ref, g_ref, wrw_ref, bf_ref, uu_ref, bu_ref,
                 c_ref, proj_ref, carry_ref, *, s_chunk, hidden_pad):
    """Per grid step (b, s):
         facts_ref: (s_chunk, B_blk, Ep)   g_ref : (s_chunk, B_blk, 1)
         wrw_ref  : (Ep, 2*Hp)             bf_ref: (1, 2*Hp)   fused [Wr|W] w / bias
         uu_ref   : (Hp, 2*Hp)             bu_ref: (1, Hp)     fused [Ur|U] w, U bias
         c_ref    : (B_blk, Hp)  output block (same block across the s axis)
         proj_ref : (s_chunk, B_blk, 2*Hp) scratch; carry_ref: (B_blk, Hp) f32 carry
    """
    Hp = hidden_pad
    Bblk = carry_ref.shape[0]
    Ep = facts_ref.shape[-1]
    s_idx = pl.program_id(1)

    @pl.when(s_idx == 0)
    def _():
        carry_ref[...] = jnp.zeros_like(carry_ref)

    # ---- Phase 1: one fused MXU matmul projects the whole chunk of facts ----
    # (the grid pipeline DMAs the next chunk from HBM while this runs).
    facts = facts_ref[...].reshape(s_chunk * Bblk, Ep)
    proj = jnp.dot(facts, wrw_ref[...], preferred_element_type=jnp.float32)
    proj = proj + bf_ref[...]
    proj_ref[...] = proj.reshape(s_chunk, Bblk, 2 * Hp).astype(proj_ref.dtype)

    # Loop-invariant loads hoisted off the serial chain.
    uu = uu_ref[...]                        # (Hp, 2*Hp)
    bu = bu_ref[...]                        # (1, Hp)  U bias (inside r * (U·C + b))
    g_all = g_ref[...]                      # (s_chunk, B_blk, 1): one load, not per step

    # ---- Phase 2: serial recurrence over the chunk (bounded static unroll) ---
    # NOTE: pinning `uu` as a stationary MXU RHS (matmul_push_rhs/acc_lhs/pop)
    # could shave further per-step latency; jnp.dot kept for portability.
    C = carry_ref[...]
    for s in range(s_chunk):
        pc = proj_ref[s].astype(jnp.float32)                 # (B_blk, 2*Hp)
        cu = jnp.dot(C.astype(uu.dtype), uu,
                     preferred_element_type=jnp.float32)     # (B_blk, 2*Hp)
        r = jax.nn.sigmoid(pc[:, :Hp] + cu[:, :Hp])
        h_tilda = jnp.tanh(pc[:, Hp:] + r * (cu[:, Hp:] + bu))
        C = C + g_all[s] * (h_tilda - C)    # == g*h_tilda + (1-g)*C, shorter chain
    carry_ref[...] = C

    @pl.when(s_idx == pl.num_programs(1) - 1)
    def _():
        c_ref[...] = C.astype(c_ref.dtype)


def attention_gru(facts, G, params, *, compute_dtype=jnp.float32,
                  s_chunk=None, b_block=None):
    """facts: (B, S, E) f32, G: (B, S) f32 -> C: (B, H) f32.

    compute_dtype: dtype of the MXU operands / streamed facts / proj scratch.
    f32 (default) matches the PyTorch reference to ~1e-5; bf16 halves streamed
    bytes and VMEM on v6e/v7x at reduced accuracy (gating stays f32 either way).
    """
    B, S, E = facts.shape
    H = params["Ur_w"].shape[0]

    cdt = jnp.dtype(compute_dtype)
    proj_dtype = jnp.float32 if cdt == jnp.dtype(jnp.float32) else cdt
    pdt = jnp.dtype(proj_dtype)

    Hp = _round_up(H, 128)                                   # lane
    Ep = _round_up(E, 128)                                   # lane
    sub = {4: 8, 2: 16, 1: 32}.get(cdt.itemsize, 8)          # sublane multiple

    # Batch blocking: "parallel" grid axis (v7x runs blocks on both TCs).
    bp0 = _round_up(B, sub)
    if b_block is None:
        b_block = min(64, bp0 if bp0 < 2 * sub else _round_up(bp0 // 2, sub))
    b_block = _round_up(b_block, sub)
    Bp = _round_up(max(bp0, b_block), b_block)
    nb = Bp // b_block

    # Sequence chunking: phase-1 projections stream through the grid pipeline.
    if s_chunk is None:
        s_chunk = min(S, 16)
    Sp = _round_up(S, s_chunk)
    ns = Sp // s_chunk

    def pad2(w, r, c):
        return jnp.pad(w, ((0, r - w.shape[0]), (0, c - w.shape[1])))

    # Sequence-major + zero padding (exact: padded batch rows / padded steps
    # have g = 0 so C stays put; padded lanes stay 0; sliced off at the end).
    facts_sm = jnp.transpose(facts, (1, 0, 2)).astype(jnp.float32)     # (S, B, E)
    facts_sm = jnp.pad(facts_sm, ((0, Sp - S), (0, Bp - B), (0, Ep - E)))
    facts_sm = facts_sm.astype(cdt)
    G_sm = jnp.transpose(G, (1, 0)).astype(jnp.float32)[..., None]     # (S, B, 1)
    G_sm = jnp.pad(G_sm, ((0, Sp - S), (0, Bp - B), (0, 0)))

    # Fused fact weights [Wr | W]^T -> (Ep, 2*Hp); bias [Wr_b + Ur_b | W_b].
    wrw = jnp.concatenate([pad2(params["Wr_w"].T, Ep, Hp),
                           pad2(params["W_w"].T, Ep, Hp)], axis=1).astype(cdt)
    b_r = jnp.pad(params["Wr_b"] + params["Ur_b"], (0, Hp - H))
    b_h = jnp.pad(params["W_b"], (0, Hp - H))
    bias_f = jnp.concatenate([b_r, b_h])[None, :].astype(jnp.float32)  # (1, 2*Hp)

    # Fused recurrent weights [Ur | U]^T -> (Hp, 2*Hp); U bias stays separate.
    uu = jnp.concatenate([pad2(params["Ur_w"].T, Hp, Hp),
                          pad2(params["U_w"].T, Hp, Hp)], axis=1).astype(cdt)
    bu = jnp.pad(params["U_b"], (0, Hp - H))[None, :].astype(jnp.float32)

    # Explicit VMEM budget: double-buffered chunk inputs + resident weights +
    # proj scratch + carry + output block, with headroom, capped below physical.
    vmem_needed = (
        2 * s_chunk * b_block * Ep * cdt.itemsize        # facts chunks (dbuf)
        + 2 * s_chunk * b_block * 4                      # gate chunks (dbuf)
        + Ep * 2 * Hp * cdt.itemsize                     # [Wr | W]
        + Hp * 2 * Hp * cdt.itemsize                     # [Ur | U]
        + 3 * Hp * 4                                     # biases
        + s_chunk * b_block * 2 * Hp * pdt.itemsize      # proj scratch
        + 3 * b_block * Hp * 4                           # carry + out block
    )
    vmem_limit = int(min(_vmem_capacity_bytes() - (4 << 20),
                         max(32 << 20, int(vmem_needed * 1.5) + (2 << 20))))

    cost = pl.CostEstimate(
        flops=int(2 * Sp * Bp * Ep * 2 * Hp              # fact projections
                  + 2 * Sp * Bp * Hp * 2 * Hp            # recurrent matmuls
                  + 10 * Sp * Bp * Hp),                  # gating elementwise
        transcendentals=int(2 * Sp * Bp * Hp),
        bytes_accessed=int(facts_sm.size * cdt.itemsize + G_sm.size * 4
                           + (wrw.size + uu.size) * cdt.itemsize
                           + (bias_f.size + bu.size) * 4 + Bp * Hp * 4),
    )

    kernel = functools.partial(_agru_kernel, s_chunk=s_chunk, hidden_pad=Hp)

    out = pl.pallas_call(
        kernel,
        out_shape=jax.ShapeDtypeStruct((Bp, Hp), jnp.float32),
        grid_spec=pltpu.PrefetchScalarGridSpec(
            num_scalar_prefetch=0,
            grid=(nb, ns),                               # (batch blocks, seq chunks)
            in_specs=[
                pl.BlockSpec((s_chunk, b_block, Ep), lambda b, s: (s, b, 0)),
                pl.BlockSpec((s_chunk, b_block, 1), lambda b, s: (s, b, 0)),
                pl.BlockSpec((Ep, 2 * Hp), lambda b, s: (0, 0)),
                pl.BlockSpec((1, 2 * Hp), lambda b, s: (0, 0)),
                pl.BlockSpec((Hp, 2 * Hp), lambda b, s: (0, 0)),
                pl.BlockSpec((1, Hp), lambda b, s: (0, 0)),
            ],
            out_specs=pl.BlockSpec((b_block, Hp), lambda b, s: (b, 0)),
            scratch_shapes=[
                pltpu.VMEM((s_chunk, b_block, 2 * Hp), proj_dtype),  # chunk projections
                pltpu.VMEM((b_block, Hp), jnp.float32),              # C carry
            ],
        ),
        compiler_params=pltpu.CompilerParams(
            dimension_semantics=("parallel", "arbitrary"),
            vmem_limit_bytes=vmem_limit,
        ),
        cost_estimate=cost,
    )(facts_sm, G_sm, wrw, bias_f, uu, bu)

    return out[:B, :H]


def init_params(key, input_size, hidden_size):
    """Deterministic init matching the module's shapes.
    Weights: xavier-normal (as in __init__); biases: torch Linear default uniform."""
    ks = jax.random.split(key, 8)

    def xavier_normal(k, out_dim, in_dim):
        std = (2.0 / (in_dim + out_dim)) ** 0.5
        return std * jax.random.normal(k, (out_dim, in_dim), jnp.float32)

    def bias(k, in_dim, out_dim):
        bound = 1.0 / (in_dim ** 0.5)
        return jax.random.uniform(k, (out_dim,), jnp.float32, -bound, bound)

    E, H = input_size, hidden_size
    return {
        "Wr_w": xavier_normal(ks[0], H, E), "Wr_b": bias(ks[1], E, H),
        "Ur_w": xavier_normal(ks[2], H, H), "Ur_b": bias(ks[3], H, H),
        "W_w":  xavier_normal(ks[4], H, E), "W_b":  bias(ks[5], E, H),
        "U_w":  xavier_normal(ks[6], H, H), "U_b":  bias(ks[7], H, H),
    }


def attention_gru_ref(facts, G, params):
    """Pure-JAX reference of the PyTorch forward."""
    B, S, E = facts.shape
    H = params["Ur_w"].shape[0]
    C = jnp.zeros((B, H), jnp.float32)
    for sid in range(S):
        fact = facts[:, sid, :]
        g = G[:, sid][:, None]
        r = jax.nn.sigmoid(fact @ params["Wr_w"].T + params["Wr_b"]
                           + C @ params["Ur_w"].T + params["Ur_b"])
        h_tilda = jnp.tanh(fact @ params["W_w"].T + params["W_b"]
                           + r * (C @ params["U_w"].T + params["U_b"]))
        C = g * h_tilda + (1.0 - g) * C
    return C


if __name__ == "__main__":
    key = jax.random.PRNGKey(0)
    k_f, k_g, k_p, k_f2, k_g2, k_p2 = jax.random.split(key, 6)

    # --- Test 1: module-sized shapes (input_size == hidden_size), f32. -------
    B, S, E, H = 2, 8, 32, 32
    facts = jax.random.normal(k_f, (B, S, E), jnp.float32)
    G = jax.nn.softmax(jax.random.normal(k_g, (B, S), jnp.float32), axis=-1)
    params = init_params(k_p, E, H)

    C = jax.block_until_ready(attention_gru(facts, G, params))
    C_ref = attention_gru_ref(facts, G, params)
    assert C.shape == (B, H)
    assert jnp.allclose(C, C_ref, atol=1e-5, rtol=1e-4), "f32 mismatch vs reference"

    # --- Test 2: exercises padding + the (batch-block, seq-chunk) grid. ------
    B2, S2, E2, H2 = 20, 20, 40, 24
    facts2 = jax.random.normal(k_f2, (B2, S2, E2), jnp.float32)
    G2 = jax.nn.softmax(jax.random.normal(k_g2, (B2, S2), jnp.float32), axis=-1)
    params2 = init_params(k_p2, E2, H2)

    C2 = jax.block_until_ready(
        attention_gru(facts2, G2, params2, s_chunk=8, b_block=8))
    C2_ref = attention_gru_ref(facts2, G2, params2)
    assert C2.shape == (B2, H2)
    assert jnp.allclose(C2, C2_ref, atol=1e-5, rtol=1e-4), "grid mismatch vs reference"

    # --- Test 3: bf16 compute / bf16 proj-scratch path (loose tolerance). ----
    C3 = jax.block_until_ready(
        attention_gru(facts, G, params, compute_dtype=jnp.bfloat16))
    assert C3.shape == (B, H)
    assert jnp.allclose(C3, C_ref, atol=1e-1, rtol=1e-1), "bf16 path diverged"

    print("KERNEL_OK")
</pallas_src>

<mosaic_0001>
module attributes {stable_mosaic.version = 11 : i64} {
  func.func @_agru_kernel(%arg0: i32, %arg1: i32, %arg2: memref<8x8x128xf32, #tpu.memory_space<vmem>>, %arg3: memref<8x8x1xf32, #tpu.memory_space<vmem>>, %arg4: memref<128x256xf32, #tpu.memory_space<vmem>>, %arg5: memref<1x256xf32, #tpu.memory_space<vmem>>, %arg6: memref<128x256xf32, #tpu.memory_space<vmem>>, %arg7: memref<1x128xf32, #tpu.memory_space<vmem>>, %arg8: memref<8x128xf32, #tpu.memory_space<vmem>>, %arg9: memref<8x8x256xf32, #tpu.memory_space<vmem>>, %arg10: memref<8x128xf32, #tpu.memory_space<vmem>>) attributes {dimension_semantics = [#tpu.dimension_semantics<parallel>, #tpu.dimension_semantics<arbitrary>], iteration_bounds = array<i64: 1, 1>, scalar_prefetch = 0 : i64, scratch_operands = 2 : i64, tpu.core_type = #tpu.core_type<tc>, window_params = [{transform_indices = @transform_0, window_bounds = array<i64: 8, 8, 128>}, {transform_indices = @transform_1, window_bounds = array<i64: 8, 8, 1>}, {pipeline_mode = #tpu.pipeline_mode<synchronous>, transform_indices = @transform_2, window_bounds = array<i64: 128, 256>}, {pipeline_mode = #tpu.pipeline_mode<synchronous>, transform_indices = @transform_3, window_bounds = array<i64: 1, 256>}, {pipeline_mode = #tpu.pipeline_mode<synchronous>, transform_indices = @transform_4, window_bounds = array<i64: 128, 256>}, {pipeline_mode = #tpu.pipeline_mode<synchronous>, transform_indices = @transform_5, window_bounds = array<i64: 1, 128>}, {transform_indices = @transform_6, window_bounds = array<i64: 8, 128>}]} {
    %c0_i32 = arith.constant 0 : i32
    %0 = arith.cmpi eq, %arg1, %c0_i32 : i32
    %1 = arith.extui %0 : i1 to i32
    %c0_i32_0 = arith.constant 0 : i32
    %2 = arith.cmpi ne, %1, %c0_i32_0 : i32
    scf.if %2 {
      %cst_56 = arith.constant 0.000000e+00 : f32
      %212 = vector.broadcast %cst_56 : f32 to vector<8x128xf32>
      %c0_57 = arith.constant 0 : index
      %c0_58 = arith.constant 0 : index
      %213 = vector.load %arg10[%c0_57, %c0_58] : memref<8x128xf32, #tpu.memory_space<vmem>>, vector<8x128xf32>
      tpu.vector_store %arg10[%c0_57, %c0_58], %212 {strides = array<i32>} : memref<8x128xf32, #tpu.memory_space<vmem>>, vector<8x128xf32>,
    } else {
    }
    %c0 = arith.constant 0 : index
    %c0_1 = arith.constant 0 : index
    %c0_2 = arith.constant 0 : index
    %3 = vector.load %arg2[%c0, %c0_1, %c0_2] : memref<8x8x128xf32, #tpu.memory_space<vmem>>, vector<8x8x128xf32>
    %4 = vector.shape_cast %3 : vector<8x8x128xf32> to vector<64x128xf32>
    %c0_3 = arith.constant 0 : index
    %c0_4 = arith.constant 0 : index
    %5 = vector.load %arg4[%c0_3, %c0_4] : memref<128x256xf32, #tpu.memory_space<vmem>>, vector<128x256xf32>
    %cst = arith.constant dense<0.000000e+00> : vector<64x256xf32>
    %6 = tpu.matmul %4, %5, %cst {dimension_numbers = #tpu.dot_dimension_numbers<[1], [0], [0], [1], [0, 0, 1, 1], [], []>} : vector<64x128xf32>, vector<128x256xf32>, vector<64x256xf32> -> vector<64x256xf32>
    %c0_5 = arith.constant 0 : index
    %c0_6 = arith.constant 0 : index
    %7 = vector.load %arg5[%c0_5, %c0_6] : memref<1x256xf32, #tpu.memory_space<vmem>>, vector<1x256xf32>
    %8 = vector.broadcast %7 : vector<1x256xf32> to vector<64x256xf32>
    %9 = arith.addf %6, %8 : vector<64x256xf32>
    %10 = vector.shape_cast %9 : vector<64x256xf32> to vector<8x8x256xf32>
    %c0_7 = arith.constant 0 : index
    %c0_8 = arith.constant 0 : index
    %c0_9 = arith.constant 0 : index
    %11 = vector.load %arg9[%c0_7, %c0_8, %c0_9] : memref<8x8x256xf32, #tpu.memory_space<vmem>>, vector<8x8x256xf32>
    tpu.vector_store %arg9[%c0_7, %c0_8, %c0_9], %10 {strides = array<i32>} : memref<8x8x256xf32, #tpu.memory_space<vmem>>, vector<8x8x256xf32>,
    %c0_10 = arith.constant 0 : index
    %c0_11 = arith.constant 0 : index
    %12 = vector.load %arg6[%c0_10, %c0_11] : memref<128x256xf32, #tpu.memory_space<vmem>>, vector<128x256xf32>
    %c0_12 = arith.constant 0 : index
    %c0_13 = arith.constant 0 : index
    %13 = vector.load %arg7[%c0_12, %c0_13] : memref<1x128xf32, #tpu.memory_space<vmem>>, vector<1x128xf32>
    %c0_14 = arith.constant 0 : index
    %c0_15 = arith.constant 0 : index
    %c0_16 = arith.constant 0 : index
    %14 = vector.load %arg3[%c0_14, %c0_15, %c0_16] : memref<8x8x1xf32, #tpu.memory_space<vmem>>, vector<8x8x1xf32>
    %c0_17 = arith.constant 0 : index
    %c0_18 = arith.constant 0 : index
    %15 = vector.load %arg10[%c0_17, %c0_18] : memref<8x128xf32, #tpu.memory_space<vmem>>, vector<8x128xf32>
    %c0_19 = arith.constant 0 : index
    %c0_20 = arith.constant 0 : index
    %c0_21 = arith.constant 0 : index
    %16 = vector.load %arg9[%c0_19, %c0_20, %c0_21] : memref<8x8x256xf32, #tpu.memory_space<vmem>>, vector<1x8x256xf32>
    %17 = vector.shape_cast %16 : vector<1x8x256xf32> to vector<8x256xf32>
    %cst_22 = arith.constant dense<0.000000e+00> : vector<8x256xf32>
    %18 = tpu.matmul %15, %12, %cst_22 {dimension_numbers = #tpu.dot_dimension_numbers<[1], [0], [0], [1], [0, 0, 1, 1], [], []>} : vector<8x128xf32>, vector<128x256xf32>, vector<8x256xf32> -> vector<8x256xf32>
    %19 = vector.extract_strided_slice %17 {offsets = [0, 0], sizes = [8, 128], strides = [1, 1]} : vector<8x256xf32> to vector<8x128xf32>
    %20 = vector.extract_strided_slice %18 {offsets = [0, 0], sizes = [8, 128], strides = [1, 1]} : vector<8x256xf32> to vector<8x128xf32>
    %21 = arith.addf %19, %20 : vector<8x128xf32>
    %22 = arith.negf %21 : vector<8x128xf32>
    %23 = math.exp %22 : vector<8x128xf32>
    %cst_23 = arith.constant 1.000000e+00 : f32
    %24 = vector.broadcast %cst_23 : f32 to vector<8x128xf32>
    %25 = arith.addf %24, %23 : vector<8x128xf32>
    %26 = arith.divf %24, %25 : vector<8x128xf32>
    %27 = vector.extract_strided_slice %17 {offsets = [0, 128], sizes = [8, 128], strides = [1, 1]} : vector<8x256xf32> to vector<8x128xf32>
    %28 = vector.extract_strided_slice %18 {offsets = [0, 128], sizes = [8, 128], strides = [1, 1]} : vector<8x256xf32> to vector<8x128xf32>
    %29 = vector.broadcast %13 : vector<1x128xf32> to vector<8x128xf32>
    %30 = arith.addf %28, %29 : vector<8x128xf32>
    %31 = arith.mulf %26, %30 : vector<8x128xf32>
    %32 = arith.addf %27, %31 : vector<8x128xf32>
    %33 = math.tanh %32 : vector<8x128xf32>
    %34 = vector.extract_strided_slice %14 {offsets = [0, 0, 0], sizes = [1, 8, 1], strides = [1, 1, 1]} : vector<8x8x1xf32> to vector<1x8x1xf32>
    %35 = vector.shape_cast %34 : vector<1x8x1xf32> to vector<8x1xf32>
    %36 = arith.subf %33, %15 : vector<8x128xf32>
    %37 = vector.broadcast %35 : vector<8x1xf32> to vector<8x128xf32>
    %38 = arith.mulf %37, %36 : vector<8x128xf32>
    %39 = arith.addf %15, %38 : vector<8x128xf32>
    %c1 = arith.constant 1 : index
    %c0_24 = arith.constant 0 : index
    %c0_25 = arith.constant 0 : index
    %40 = vector.load %arg9[%c1, %c0_24, %c0_25] : memref<8x8x256xf32, #tpu.memory_space<vmem>>, vector<1x8x256xf32>
    %41 = vector.shape_cast %40 : vector<1x8x256xf32> to vector<8x256xf32>
    %cst_26 = arith.constant dense<0.000000e+00> : vector<8x256xf32>
    %42 = tpu.matmul %39, %12, %cst_26 {dimension_numbers = #tpu.dot_dimension_numbers<[1], [0], [0], [1], [0, 0, 1, 1], [], []>} : vector<8x128xf32>, vector<128x256xf32>, vector<8x256xf32> -> vector<8x256xf32>
    %43 = vector.extract_strided_slice %41 {offsets = [0, 0], sizes = [8, 128], strides = [1, 1]} : vector<8x256xf32> to vector<8x128xf32>
    %44 = vector.extract_strided_slice %42 {offsets = [0, 0], sizes = [8, 128], strides = [1, 1]} : vector<8x256xf32> to vector<8x128xf32>
    %45 = arith.addf %43, %44 : vector<8x128xf32>
    %46 = arith.negf %45 : vector<8x128xf32>
    %47 = math.exp %46 : vector<8x128xf32>
    %cst_27 = arith.constant 1.000000e+00 : f32
    %48 = vector.broadcast %cst_27 : f32 to vector<8x128xf32>
    %49 = arith.addf %48, %47 : vector<8x128xf32>
    %50 = arith.divf %48, %49 : vector<8x128xf32>
    %51 = vector.extract_strided_slice %41 {offsets = [0, 128], sizes = [8, 128], strides = [1, 1]} : vector<8x256xf32> to vector<8x128xf32>
    %52 = vector.extract_strided_slice %42 {offsets = [0, 128], sizes = [8, 128], strides = [1, 1]} : vector<8x256xf32> to vector<8x128xf32>
    %53 = vector.broadcast %13 : vector<1x128xf32> to vector<8x128xf32>
    %54 = arith.addf %52, %53 : vector<8x128xf32>
    %55 = arith.mulf %50, %54 : vector<8x128xf32>
    %56 = arith.addf %51, %55 : vector<8x128xf32>
    %57 = math.tanh %56 : vector<8x128xf32>
    %58 = vector.extract_strided_slice %14 {offsets = [1, 0, 0], sizes = [1, 8, 1], strides = [1, 1, 1]} : vector<8x8x1xf32> to vector<1x8x1xf32>
    %59 = vector.shape_cast %58 : vector<1x8x1xf32> to vector<8x1xf32>
    %60 = arith.subf %57, %39 : vector<8x128xf32>
    %61 = vector.broadcast %59 : vector<8x1xf32> to vector<8x128xf32>
    %62 = arith.mulf %61, %60 : vector<8x128xf32>
    %63 = arith.addf %39, %62 : vector<8x128xf32>
    %c2 = arith.constant 2 : index
    %c0_28 = arith.constant 0 : index
    %c0_29 = arith.constant 0 : index
    %64 = vector.load %arg9[%c2, %c0_28, %c0_29] : memref<8x8x256xf32, #tpu.memory_space<vmem>>, vector<1x8x256xf32>
    %65 = vector.shape_cast %64 : vector<1x8x256xf32> to vector<8x256xf32>
    %cst_30 = arith.constant dense<0.000000e+00> : vector<8x256xf32>
    %66 = tpu.matmul %63, %12, %cst_30 {dimension_numbers = #tpu.dot_dimension_numbers<[1], [0], [0], [1], [0, 0, 1, 1], [], []>} : vector<8x128xf32>, vector<128x256xf32>, vector<8x256xf32> -> vector<8x256xf32>
    %67 = vector.extract_strided_slice %65 {offsets = [0, 0], sizes = [8, 128], strides = [1, 1]} : vector<8x256xf32> to vector<8x128xf32>
    %68 = vector.extract_strided_slice %66 {offsets = [0, 0], sizes = [8, 128], strides = [1, 1]} : vector<8x256xf32> to vector<8x128xf32>
    %69 = arith.addf %67, %68 : vector<8x128xf32>
    %70 = arith.negf %69 : vector<8x128xf32>
    %71 = math.exp %70 : vector<8x128xf32>
    %cst_31 = arith.constant 1.000000e+00 : f32
    %72 = vector.broadcast %cst_31 : f32 to vector<8x128xf32>
    %73 = arith.addf %72, %71 : vector<8x128xf32>
    %74 = arith.divf %72, %73 : vector<8x128xf32>
    %75 = vector.extract_strided_slice %65 {offsets = [0, 128], sizes = [8, 128], strides = [1, 1]} : vector<8x256xf32> to vector<8x128xf32>
    %76 = vector.extract_strided_slice %66 {offsets = [0, 128], sizes = [8, 128], strides = [1, 1]} : vector<8x256xf32> to vector<8x128xf32>
    %77 = vector.broadcast %13 : vector<1x128xf32> to vector<8x128xf32>
    %78 = arith.addf %76, %77 : vector<8x128xf32>
    %79 = arith.mulf %74, %78 : vector<8x128xf32>
    %80 = arith.addf %75, %79 : vector<8x128xf32>
    %81 = math.tanh %80 : vector<8x128xf32>
    %82 = vector.extract_strided_slice %14 {offsets = [2, 0, 0], sizes = [1, 8, 1], strides = [1, 1, 1]} : vector<8x8x1xf32> to vector<1x8x1xf32>
    %83 = vector.shape_cast %82 : vector<1x8x1xf32> to vector<8x1xf32>
    %84 = arith.subf %81, %63 : vector<8x128xf32>
    %85 = vector.broadcast %83 : vector<8x1xf32> to vector<8x128xf32>
    %86 = arith.mulf %85, %84 : vector<8x128xf32>
    %87 = arith.addf %63, %86 : vector<8x128xf32>
    %c3 = arith.constant 3 : index
    %c0_32 = arith.constant 0 : index
    %c0_33 = arith.constant 0 : index
    %88 = vector.load %arg9[%c3, %c0_32, %c0_33] : memref<8x8x256xf32, #tpu.memory_space<vmem>>, vector<1x8x256xf32>
    %89 = vector.shape_cast %88 : vector<1x8x256xf32> to vector<8x256xf32>
    %cst_34 = arith.constant dense<0.000000e+00> : vector<8x256xf32>
    %90 = tpu.matmul %87, %12, %cst_34 {dimension_numbers = #tpu.dot_dimension_numbers<[1], [0], [0], [1], [0, 0, 1, 1], [], []>} : vector<8x128xf32>, vector<128x256xf32>, vector<8x256xf32> -> vector<8x256xf32>
    %91 = vector.extract_strided_slice %89 {offsets = [0, 0], sizes = [8, 128], strides = [1, 1]} : vector<8x256xf32> to vector<8x128xf32>
    %92 = vector.extract_strided_slice %90 {offsets = [0, 0], sizes = [8, 128], strides = [1, 1]} : vector<8x256xf32> to vector<8x128xf32>
    %93 = arith.addf %91, %92 : vector<8x128xf32>
    %94 = arith.negf %93 : vector<8x128xf32>
    %95 = math.exp %94 : vector<8x128xf32>
    %cst_35 = arith.constant 1.000000e+00 : f32
    %96 = vector.broadcast %cst_35 : f32 to vector<8x128xf32>
    %97 = arith.addf %96, %95 : vector<8x128xf32>
    %98 = arith.divf %96, %97 : vector<8x128xf32>
    %99 = vector.extract_strided_slice %89 {offsets = [0, 128], sizes = [8, 128], strides = [1, 1]} : vector<8x256xf32> to vector<8x128xf32>
    %100 = vector.extract_strided_slice %90 {offsets = [0, 128], sizes = [8, 128], strides = [1, 1]} : vector<8x256xf32> to vector<8x128xf32>
    %101 = vector.broadcast %13 : vector<1x128xf32> to vector<8x128xf32>
    %102 = arith.addf %100, %101 : vector<8x128xf32>
    %103 = arith.mulf %98, %102 : vector<8x128xf32>
    %104 = arith.addf %99, %103 : vector<8x128xf32>
    %105 = math.tanh %104 : vector<8x128xf32>
    %106 = vector.extract_strided_slice %14 {offsets = [3, 0, 0], sizes = [1, 8, 1], strides = [1, 1, 1]} : vector<8x8x1xf32> to vector<1x8x1xf32>
    %107 = vector.shape_cast %106 : vector<1x8x1xf32> to vector<8x1xf32>
    %108 = arith.subf %105, %87 : vector<8x128xf32>
    %109 = vector.broadcast %107 : vector<8x1xf32> to vector<8x128xf32>
    %110 = arith.mulf %109, %108 : vector<8x128xf32>
    %111 = arith.addf %87, %110 : vector<8x128xf32>
    %c4 = arith.constant 4 : index
    %c0_36 = arith.constant 0 : index
    %c0_37 = arith.constant 0 : index
    %112 = vector.load %arg9[%c4, %c0_36, %c0_37] : memref<8x8x256xf32, #tpu.memory_space<vmem>>, vector<1x8x256xf32>
    %113 = vector.shape_cast %112 : vector<1x8x256xf32> to vector<8x256xf32>
    %cst_38 = arith.constant dense<0.000000e+00> : vector<8x256xf32>
    %114 = tpu.matmul %111, %12, %cst_38 {dimension_numbers = #tpu.dot_dimension_numbers<[1], [0], [0], [1], [0, 0, 1, 1], [], []>} : vector<8x128xf32>, vector<128x256xf32>, vector<8x256xf32> -> vector<8x256xf32>
    %115 = vector.extract_strided_slice %113 {offsets = [0, 0], sizes = [8, 128], strides = [1, 1]} : vector<8x256xf32> to vector<8x128xf32>
    %116 = vector.extract_strided_slice %114 {offsets = [0, 0], sizes = [8, 128], strides = [1, 1]} : vector<8x256xf32> to vector<8x128xf32>
    %117 = arith.addf %115, %116 : vector<8x128xf32>
    %118 = arith.negf %117 : vector<8x128xf32>
    %119 = math.exp %118 : vector<8x128xf32>
    %cst_39 = arith.constant 1.000000e+00 : f32
    %120 = vector.broadcast %cst_39 : f32 to vector<8x128xf32>
    %121 = arith.addf %120, %119 : vector<8x128xf32>
    %122 = arith.divf %120, %121 : vector<8x128xf32>
    %123 = vector.extract_strided_slice %113 {offsets = [0, 128], sizes = [8, 128], strides = [1, 1]} : vector<8x256xf32> to vector<8x128xf32>
    %124 = vector.extract_strided_slice %114 {offsets = [0, 128], sizes = [8, 128], strides = [1, 1]} : vector<8x256xf32> to vector<8x128xf32>
    %125 = vector.broadcast %13 : vector<1x128xf32> to vector<8x128xf32>
    %126 = arith.addf %124, %125 : vector<8x128xf32>
    %127 = arith.mulf %122, %126 : vector<8x128xf32>
    %128 = arith.addf %123, %127 : vector<8x128xf32>
    %129 = math.tanh %128 : vector<8x128xf32>
    %130 = vector.extract_strided_slice %14 {offsets = [4, 0, 0], sizes = [1, 8, 1], strides = [1, 1, 1]} : vector<8x8x1xf32> to vector<1x8x1xf32>
    %131 = vector.shape_cast %130 : vector<1x8x1xf32> to vector<8x1xf32>
    %132 = arith.subf %129, %111 : vector<8x128xf32>
    %133 = vector.broadcast %131 : vector<8x1xf32> to vector<8x128xf32>
    %134 = arith.mulf %133, %132 : vector<8x128xf32>
    %135 = arith.addf %111, %134 : vector<8x128xf32>
    %c5 = arith.constant 5 : index
    %c0_40 = arith.constant 0 : index
    %c0_41 = arith.constant 0 : index
    %136 = vector.load %arg9[%c5, %c0_40, %c0_41] : memref<8x8x256xf32, #tpu.memory_space<vmem>>, vector<1x8x256xf32>
    %137 = vector.shape_cast %136 : vector<1x8x256xf32> to vector<8x256xf32>
    %cst_42 = arith.constant dense<0.000000e+00> : vector<8x256xf32>
    %138 = tpu.matmul %135, %12, %cst_42 {dimension_numbers = #tpu.dot_dimension_numbers<[1], [0], [0], [1], [0, 0, 1, 1], [], []>} : vector<8x128xf32>, vector<128x256xf32>, vector<8x256xf32> -> vector<8x256xf32>
    %139 = vector.extract_strided_slice %137 {offsets = [0, 0], sizes = [8, 128], strides = [1, 1]} : vector<8x256xf32> to vector<8x128xf32>
    %140 = vector.extract_strided_slice %138 {offsets = [0, 0], sizes = [8, 128], strides = [1, 1]} : vector<8x256xf32> to vector<8x128xf32>
    %141 = arith.addf %139, %140 : vector<8x128xf32>
    %142 = arith.negf %141 : vector<8x128xf32>
    %143 = math.exp %142 : vector<8x128xf32>
    %cst_43 = arith.constant 1.000000e+00 : f32
    %144 = vector.broadcast %cst_43 : f32 to vector<8x128xf32>
    %145 = arith.addf %144, %143 : vector<8x128xf32>
    %146 = arith.divf %144, %145 : vector<8x128xf32>
    %147 = vector.extract_strided_slice %137 {offsets = [0, 128], sizes = [8, 128], strides = [1, 1]} : vector<8x256xf32> to vector<8x128xf32>
    %148 = vector.extract_strided_slice %138 {offsets = [0, 128], sizes = [8, 128], strides = [1, 1]} : vector<8x256xf32> to vector<8x128xf32>
    %149 = vector.broadcast %13 : vector<1x128xf32> to vector<8x128xf32>
    %150 = arith.addf %148, %149 : vector<8x128xf32>
    %151 = arith.mulf %146, %150 : vector<8x128xf32>
    %152 = arith.addf %147, %151 : vector<8x128xf32>
    %153 = math.tanh %152 : vector<8x128xf32>
    %154 = vector.extract_strided_slice %14 {offsets = [5, 0, 0], sizes = [1, 8, 1], strides = [1, 1, 1]} : vector<8x8x1xf32> to vector<1x8x1xf32>
    %155 = vector.shape_cast %154 : vector<1x8x1xf32> to vector<8x1xf32>
    %156 = arith.subf %153, %135 : vector<8x128xf32>
    %157 = vector.broadcast %155 : vector<8x1xf32> to vector<8x128xf32>
    %158 = arith.mulf %157, %156 : vector<8x128xf32>
    %159 = arith.addf %135, %158 : vector<8x128xf32>
    %c6 = arith.constant 6 : index
    %c0_44 = arith.constant 0 : index
    %c0_45 = arith.constant 0 : index
    %160 = vector.load %arg9[%c6, %c0_44, %c0_45] : memref<8x8x256xf32, #tpu.memory_space<vmem>>, vector<1x8x256xf32>
    %161 = vector.shape_cast %160 : vector<1x8x256xf32> to vector<8x256xf32>
    %cst_46 = arith.constant dense<0.000000e+00> : vector<8x256xf32>
    %162 = tpu.matmul %159, %12, %cst_46 {dimension_numbers = #tpu.dot_dimension_numbers<[1], [0], [0], [1], [0, 0, 1, 1], [], []>} : vector<8x128xf32>, vector<128x256xf32>, vector<8x256xf32> -> vector<8x256xf32>
    %163 = vector.extract_strided_slice %161 {offsets = [0, 0], sizes = [8, 128], strides = [1, 1]} : vector<8x256xf32> to vector<8x128xf32>
    %164 = vector.extract_strided_slice %162 {offsets = [0, 0], sizes = [8, 128], strides = [1, 1]} : vector<8x256xf32> to vector<8x128xf32>
    %165 = arith.addf %163, %164 : vector<8x128xf32>
    %166 = arith.negf %165 : vector<8x128xf32>
    %167 = math.exp %166 : vector<8x128xf32>
    %cst_47 = arith.constant 1.000000e+00 : f32
    %168 = vector.broadcast %cst_47 : f32 to vector<8x128xf32>
    %169 = arith.addf %168, %167 : vector<8x128xf32>
    %170 = arith.divf %168, %169 : vector<8x128xf32>
    %171 = vector.extract_strided_slice %161 {offsets = [0, 128], sizes = [8, 128], strides = [1, 1]} : vector<8x256xf32> to vector<8x128xf32>
    %172 = vector.extract_strided_slice %162 {offsets = [0, 128], sizes = [8, 128], strides = [1, 1]} : vector<8x256xf32> to vector<8x128xf32>
    %173 = vector.broadcast %13 : vector<1x128xf32> to vector<8x128xf32>
    %174 = arith.addf %172, %173 : vector<8x128xf32>
    %175 = arith.mulf %170, %174 : vector<8x128xf32>
    %176 = arith.addf %171, %175 : vector<8x128xf32>
    %177 = math.tanh %176 : vector<8x128xf32>
    %178 = vector.extract_strided_slice %14 {offsets = [6, 0, 0], sizes = [1, 8, 1], strides = [1, 1, 1]} : vector<8x8x1xf32> to vector<1x8x1xf32>
    %179 = vector.shape_cast %178 : vector<1x8x1xf32> to vector<8x1xf32>
    %180 = arith.subf %177, %159 : vector<8x128xf32>
    %181 = vector.broadcast %179 : vector<8x1xf32> to vector<8x128xf32>
    %182 = arith.mulf %181, %180 : vector<8x128xf32>
    %183 = arith.addf %159, %182 : vector<8x128xf32>
    %c7 = arith.constant 7 : index
    %c0_48 = arith.constant 0 : index
    %c0_49 = arith.constant 0 : index
    %184 = vector.load %arg9[%c7, %c0_48, %c0_49] : memref<8x8x256xf32, #tpu.memory_space<vmem>>, vector<1x8x256xf32>
    %185 = vector.shape_cast %184 : vector<1x8x256xf32> to vector<8x256xf32>
    %cst_50 = arith.constant dense<0.000000e+00> : vector<8x256xf32>
    %186 = tpu.matmul %183, %12, %cst_50 {dimension_numbers = #tpu.dot_dimension_numbers<[1], [0], [0], [1], [0, 0, 1, 1], [], []>} : vector<8x128xf32>, vector<128x256xf32>, vector<8x256xf32> -> vector<8x256xf32>
    %187 = vector.extract_strided_slice %185 {offsets = [0, 0], sizes = [8, 128], strides = [1, 1]} : vector<8x256xf32> to vector<8x128xf32>
    %188 = vector.extract_strided_slice %186 {offsets = [0, 0], sizes = [8, 128], strides = [1, 1]} : vector<8x256xf32> to vector<8x128xf32>
    %189 = arith.addf %187, %188 : vector<8x128xf32>
    %190 = arith.negf %189 : vector<8x128xf32>
    %191 = math.exp %190 : vector<8x128xf32>
    %cst_51 = arith.constant 1.000000e+00 : f32
    %192 = vector.broadcast %cst_51 : f32 to vector<8x128xf32>
    %193 = arith.addf %192, %191 : vector<8x128xf32>
    %194 = arith.divf %192, %193 : vector<8x128xf32>
    %195 = vector.extract_strided_slice %185 {offsets = [0, 128], sizes = [8, 128], strides = [1, 1]} : vector<8x256xf32> to vector<8x128xf32>
    %196 = vector.extract_strided_slice %186 {offsets = [0, 128], sizes = [8, 128], strides = [1, 1]} : vector<8x256xf32> to vector<8x128xf32>
    %197 = vector.broadcast %13 : vector<1x128xf32> to vector<8x128xf32>
    %198 = arith.addf %196, %197 : vector<8x128xf32>
    %199 = arith.mulf %194, %198 : vector<8x128xf32>
    %200 = arith.addf %195, %199 : vector<8x128xf32>
    %201 = math.tanh %200 : vector<8x128xf32>
    %202 = vector.extract_strided_slice %14 {offsets = [7, 0, 0], sizes = [1, 8, 1], strides = [1, 1, 1]} : vector<8x8x1xf32> to vector<1x8x1xf32>
    %203 = vector.shape_cast %202 : vector<1x8x1xf32> to vector<8x1xf32>
    %204 = arith.subf %201, %183 : vector<8x128xf32>
    %205 = vector.broadcast %203 : vector<8x1xf32> to vector<8x128xf32>
    %206 = arith.mulf %205, %204 : vector<8x128xf32>
    %207 = arith.addf %183, %206 : vector<8x128xf32>
    %c0_52 = arith.constant 0 : index
    %c0_53 = arith.constant 0 : index
    %208 = vector.load %arg10[%c0_52, %c0_53] : memref<8x128xf32, #tpu.memory_space<vmem>>, vector<8x128xf32>
    tpu.vector_store %arg10[%c0_52, %c0_53], %207 {strides = array<i32>} : memref<8x128xf32, #tpu.memory_space<vmem>>, vector<8x128xf32>,
    %c0_i32_54 = arith.constant 0 : i32
    %209 = arith.cmpi eq, %arg1, %c0_i32_54 : i32
    %210 = arith.extui %209 : i1 to i32
    %c0_i32_55 = arith.constant 0 : i32
    %211 = arith.cmpi ne, %210, %c0_i32_55 : i32
    scf.if %211 {
      %c0_56 = arith.constant 0 : index
      %c0_57 = arith.constant 0 : index
      %212 = vector.load %arg8[%c0_56, %c0_57] : memref<8x128xf32, #tpu.memory_space<vmem>>, vector<8x128xf32>
      tpu.vector_store %arg8[%c0_56, %c0_57], %207 {strides = array<i32>} : memref<8x128xf32, #tpu.memory_space<vmem>>, vector<8x128xf32>,
    } else {
    }
    return
  }
  func.func @transform_0(%arg0: i32, %arg1: i32) -> (i32, i32, i32) {
    %c0_i32 = arith.constant 0 : i32
    %c0_i32_0 = arith.constant 0 : i32
    return %arg1, %arg0, %c0_i32 : i32, i32, i32
  }
  func.func @transform_1(%arg0: i32, %arg1: i32) -> (i32, i32, i32) {
    %c0_i32 = arith.constant 0 : i32
    %c0_i32_0 = arith.constant 0 : i32
    return %arg1, %arg0, %c0_i32 : i32, i32, i32
  }
  func.func @transform_2(%arg0: i32, %arg1: i32) -> (i32, i32) {
    %c0_i32 = arith.constant 0 : i32
    %c0_i32_0 = arith.constant 0 : i32
    %c0_i32_1 = arith.constant 0 : i32
    return %c0_i32, %c0_i32_0 : i32, i32
  }
  func.func @transform_3(%arg0: i32, %arg1: i32) -> (i32, i32) {
    %c0_i32 = arith.constant 0 : i32
    %c0_i32_0 = arith.constant 0 : i32
    %c0_i32_1 = arith.constant 0 : i32
    return %c0_i32, %c0_i32_0 : i32, i32
  }
  func.func @transform_4(%arg0: i32, %arg1: i32) -> (i32, i32) {
    %c0_i32 = arith.constant 0 : i32
    %c0_i32_0 = arith.constant 0 : i32
    %c0_i32_1 = arith.constant 0 : i32
    return %c0_i32, %c0_i32_0 : i32, i32
  }
  func.func @transform_5(%arg0: i32, %arg1: i32) -> (i32, i32) {
    %c0_i32 = arith.constant 0 : i32
    %c0_i32_0 = arith.constant 0 : i32
    %c0_i32_1 = arith.constant 0 : i32
    return %c0_i32, %c0_i32_0 : i32, i32
  }
  func.func @transform_6(%arg0: i32, %arg1: i32) -> (i32, i32) {
    %c0_i32 = arith.constant 0 : i32
    %c0_i32_0 = arith.constant 0 : i32
    return %arg0, %c0_i32 : i32, i32
  }
}

</mosaic_0001>

<bundles_post_ra>
// kernel: tpu_custom_call.1
= control target key start
LH: loop header
LB: loop body
LE: loop exit
PB: predicated region body
PF: predicated region fallthrough
CT: control target
= control target key end

     0   :  { %11 = vsyncpa [#allocation5], 0  ;;  %s1848_s0 = inlined_call_operand.vmem [shape: f32[8,8,128], index: 0, kind: input, shape index: {}]   ;;  %s1849_s1 = inlined_call_operand.vmem [shape: f32[8,8,1], index: 1, kind: input, shape index: {}]   ;;  %s1850_s2 = inlined_call_operand.hbm [shape: f32[128,256], index: 2, kind: input, shape index: {}]   ;;  %s1851_s3 = inlined_call_operand.vmem [shape: f32[1,256], index: 3, kind: input, shape index: {}]   ;;  %s1852_s4 = inlined_call_operand.hbm [shape: f32[128,256], index: 4, kind: input, shape index: {}]   ;;  %s1853_s5 = inlined_call_operand.vmem [shape: f32[1,128], index: 5, kind: input, shape index: {}]   ;;  %s1854_s6 = inlined_call_operand.hbm [shape: f32[8,128], index: 6, kind: output, shape index: {}]  }
   0x1   :  { %12 = vsyncpa [#allocation8], 0 }
   0x2   :  { %13 = vsyncpa [#allocation6], 0  ;;  %s1476_s21 = smov [#allocation4]   ;;  %s1404_s25 = scalar_lea.hbm %s1850_s2, 4096 }
   0x3   :  { %s23_s22 = sshll.u32 %s1476_s21, 4  ;;  %p1405_p0 = scmp.ne.s32.totalorder %s1850_s2, %s1404_s25  ;;  %s24_s22 = int_to_ptr.vmem [resolvable:$true] %s23_s22 }
   0x4   :  { %p1408_p1 = scmp.lt.u32.totalorder %s1404_s25, %s1850_s2 }
   0x6   :  { %p1410_p2 = pnand %p1408_p1, %p1405_p0 }
   0x8   :  { %1413 = shalt.err (!%p1410_p2)
}
   0x9   :  { %s1414_s30 = scalar_lea.vmem %s24_s22, 4096  ;;  %p1419_p4 = scmp.lt.s32.totalorder %s24_s22, %s24_s22 }
   0xa   :  { %p1415_p3 = scmp.ne.s32.totalorder %s24_s22, %s1414_s30  ;;  %p1420_p5 = scmp.lt.s32.totalorder %s1414_s30, %s1414_s30 }
   0xc   :  { %p1421_p6 = por %p1420_p5, %p1419_p4 }
   0xe   :  { %p1422_p7 = pnand %p1421_p6, %p1415_p3 }
  0x10   :  { %1425 = shalt.err (!%p1422_p7)
}
  0x11   :  { %s1477_s7 = smov 256   ;;  %s1478_s8 = smov 16  }
  0x12   :  { %29 = dma.hbm_to_vmem [thread:$0]  %s1850_s2, 4096, %s24_s22, [#allocation5], %s1477_s7, %s1477_s7, %s1478_s8  }
  0x13   :  { %s1479_s11 = smov [#allocation7]   ;;  %s1426_s15 = scalar_lea.hbm %s1852_s4, 4096 }
  0x14   :  { %s37_s12 = sshll.u32 %s1479_s11, 4  ;;  %p1427_p8 = scmp.ne.s32.totalorder %s1852_s4, %s1426_s15  ;;  %s38_s12 = int_to_ptr.vmem [resolvable:$true] %s37_s12 }
  0x15   :  { %p1430_p9 = scmp.lt.u32.totalorder %s1426_s15, %s1852_s4 }
  0x17   :  { %p1432_p10 = pnand %p1430_p9, %p1427_p8 }
  0x19   :  { %1435 = shalt.err (!%p1432_p10)
}
  0x1a   :  { %s1436_s20 = scalar_lea.vmem %s38_s12, 4096  ;;  %p1441_p12 = scmp.lt.s32.totalorder %s38_s12, %s38_s12 }
  0x1b   :  { %p1437_p11 = scmp.ne.s32.totalorder %s38_s12, %s1436_s20  ;;  %p1442_p13 = scmp.lt.s32.totalorder %s1436_s20, %s1436_s20 }
  0x1d   :  { %p1443_p0 = por %p1442_p13, %p1441_p12 }
  0x1f   :  { %p1444_p1 = pnand %p1443_p0, %p1437_p11 }
  0x21   :  { %1447 = shalt.err (!%p1444_p1)
}
  0x22   :  { %43 = dma.hbm_to_vmem [thread:$0]  %s1852_s4, 4096, %s38_s12, [#allocation8], %s1477_s7, %s1477_s7, %s1478_s8  }
  0x23   :  { %1470 = dma.done.wait [#allocation5], 4096  }
  0x24   :  { %1471 = vsyncadd [#allocation5], 4294963200 }
  0x25   :  { %1472 = dma.done.wait [#allocation8], 4096  }
  0x26   :  { %1473 = vsyncadd [#allocation8], 4294963200  ;;  %v1480_v0 = vmov 0.0   ;;  %v1481_v1 = vmov 0   ;;  %v66_v2 = vld [vmem:[#allocation4 + $0x8] sm:$0xff]  ;;  %v68_v3 = vld [vmem:[#allocation4 + $0x18] sm:$0xff] }
  0x27   :  { %173 = vmatprep.mubr.f32.mxu0 %v1480_v0  ;;  %346 = vmatprep.mubr.f32.mxu1 %v1480_v0  ;;  %v65_v4 = vld [vmem:[#allocation4] sm:$0xff]  ;;  %v1059_v5 = vpack.c.bf16 %v68_v3, %v66_v2  ;;  %v67_v6 = vld [vmem:[#allocation4 + $0x10] sm:$0xff]  ;;  %v239_v7 = vld [vmem:[#allocation7 + $0x8] sm:$0xff] }
  0x28   :  { %1354 = vset.pattern.permute.xlu0 %v1481_v1  ;;  %1355 = vset.pattern.permute.xlu1 %v1481_v1  ;;  %v241_v8 = vld [vmem:[#allocation7 + $0x18] sm:$0xff]  ;;  %v1061_v9 = vpack.c.bf16 %v67_v6, %v65_v4  ;;  %v238_v11 = vld [vmem:[#allocation7] sm:$0xff]  ;;  %v240_v12 = vld [vmem:[#allocation7 + $0x10] sm:$0xff] }
  0x29   :  { %v1544_v10 = vpack.c.bf16 %v241_v8, %v239_v7  ;;  %v70_v13 = vld [vmem:[#allocation4 + $0x28] sm:$0xff]  ;;  %1060 = vmatprep.subr.bf16.mxu0 %v1059_v5  ;;  %v1546_v14 = vpack.c.bf16 %v240_v12, %v238_v11  ;;  %v72_v15 = vld [vmem:[#allocation4 + $0x38] sm:$0xff]  ;;  %v69_v16 = vld [vmem:[#allocation4 + $0x20] sm:$0xff] }
  0x2a   :  { %v71_v17 = vld [vmem:[#allocation4 + $0x30] sm:$0xff]  ;;  %1062 = vmatpush1.bf16.msra.mxu0 %v1061_v9  ;;  %v1063_v18 = vpack.c.bf16 %v72_v15, %v70_v13  ;;  %v243_v20 = vld [vmem:[#allocation7 + $0x28] sm:$0xff]  ;;  %v245_v21 = vld [vmem:[#allocation7 + $0x38] sm:$0xff] }
  0x2b   :  { %1092 = vmatprep.subr.bf16.mxu1 %v1544_v10  ;;  %v1065_v19 = vpack.c.bf16 %v71_v17, %v69_v16  ;;  %v242_v22 = vld [vmem:[#allocation7 + $0x20] sm:$0xff]  ;;  %v1550_v23 = vpack.c.bf16 %v245_v21, %v243_v20  ;;  %v244_v24 = vld [vmem:[#allocation7 + $0x30] sm:$0xff]  ;;  %v74_v25 = vld [vmem:[#allocation4 + $0x48] sm:$0xff] }
  0x2c   :  { %1094 = vmatpush1.bf16.msra.mxu1 %v1546_v14  ;;  %v76_v26 = vld [vmem:[#allocation4 + $0x58] sm:$0xff]  ;;  %1064 = vmatprep.subr.bf16.mxu0 %v1063_v18  ;;  %v1552_v27 = vpack.c.bf16 %v244_v24, %v242_v22  ;;  %v73_v29 = vld [vmem:[#allocation4 + $0x40] sm:$0xff]  ;;  %v75_v30 = vld [vmem:[#allocation4 + $0x50] sm:$0xff] }
  0x2d   :  { %v1067_v28 = vpack.c.bf16 %v76_v26, %v74_v25  ;;  %v247_v31 = vld [vmem:[#allocation7 + $0x48] sm:$0xff]  ;;  %1096 = vmatprep.subr.bf16.mxu1 %v1550_v23  ;;  %v249_v32 = vld [vmem:[#allocation7 + $0x58] sm:$0xff]  ;;  %v246_v33 = vld [vmem:[#allocation7 + $0x40] sm:$0xff]  ;;  %v1069_v35 = vpack.c.bf16 %v75_v30, %v73_v29 }
  0x2e   :  { %v248_v34 = vld [vmem:[#allocation7 + $0x50] sm:$0xff]  ;;  %1066 = vmatpush1.bf16.msra.mxu0 %v1065_v19  ;;  %v1555_v36 = vpack.c.bf16 %v249_v32, %v247_v31  ;;  %v78_v37 = vld [vmem:[#allocation4 + $0x68] sm:$0xff]  ;;  %v80_v38 = vld [vmem:[#allocation4 + $0x78] sm:$0xff] }
  0x2f   :  { %v77_v39 = vld [vmem:[#allocation4 + $0x60] sm:$0xff]  ;;  %1068 = vmatprep.subr.bf16.mxu0 %v1067_v28  ;;  %v1558_v40 = vpack.c.bf16 %v248_v34, %v246_v33  ;;  %v1071_v41 = vpack.c.bf16 %v80_v38, %v78_v37  ;;  %v79_v42 = vld [vmem:[#allocation4 + $0x70] sm:$0xff]  ;;  %v251_v43 = vld [vmem:[#allocation7 + $0x68] sm:$0xff] }
  0x30   :  { %1098 = vmatpush1.bf16.msra.mxu1 %v1552_v27  ;;  %v253_v44 = vld [vmem:[#allocation7 + $0x78] sm:$0xff]  ;;  %v250_v46 = vld [vmem:[#allocation7 + $0x60] sm:$0xff]  ;;  %v252_v47 = vld [vmem:[#allocation7 + $0x70] sm:$0xff]  ;;  %v1073_v50 = vpack.c.bf16 %v79_v42, %v77_v39 }
  0x31   :  { %1100 = vmatprep.subr.bf16.mxu1 %v1555_v36  ;;  %v1561_v45 = vpack.c.bf16 %v253_v44, %v251_v43  ;;  %v82_v48 = vld [vmem:[#allocation4 + $0x88] sm:$0xff]  ;;  %v84_v49 = vld [vmem:[#allocation4 + $0x98] sm:$0xff]  ;;  %v1564_v53 = vpack.c.bf16 %v252_v47, %v250_v46  ;;  %v81_v55 = vld [vmem:[#allocation4 + $0x80] sm:$0xff] }
  0x32   :  { %1070 = vmatpush1.bf16.msra.mxu0 %v1069_v35  ;;  %v255_v51 = vld [vmem:[#allocation7 + $0x88] sm:$0xff]  ;;  %v257_v52 = vld [vmem:[#allocation7 + $0x98] sm:$0xff]  ;;  %v1075_v54 = vpack.c.bf16 %v84_v49, %v82_v48  ;;  %v83_v56 = vld [vmem:[#allocation4 + $0x90] sm:$0xff] }
  0x33   :  { %1072 = vmatprep.subr.bf16.mxu0 %v1071_v41  ;;  %v254_v57 = vld [vmem:[#allocation7 + $0x80] sm:$0xff]  ;;  %v1567_v58 = vpack.c.bf16 %v257_v52, %v255_v51  ;;  %v256_v59 = vld [vmem:[#allocation7 + $0x90] sm:$0xff]  ;;  %v86_v60 = vld [vmem:[#allocation4 + $0xa8] sm:$0xff]  ;;  %v1077_v1 = vpack.c.bf16 %v83_v56, %v81_v55  ;;  %v99_v55 = vlaneseq }
  0x34   :  { %1102 = vmatpush1.bf16.msra.mxu1 %v1558_v40  ;;  %v88_v61 = vld [vmem:[#allocation4 + $0xb8] sm:$0xff]  ;;  %v259_v62 = vld [vmem:[#allocation7 + $0xa8] sm:$0xff]  ;;  %v1570_v2 = vpack.c.bf16 %v256_v59, %v254_v57  ;;  %v85_v4 = vld [vmem:[#allocation4 + $0xa0] sm:$0xff] }
  0x35   :  { %1104 = vmatprep.subr.bf16.mxu1 %v1561_v45  ;;  %v261_v63 = vld [vmem:[#allocation7 + $0xb8] sm:$0xff]  ;;  %v1079_v3 = vpack.c.bf16 %v88_v61, %v86_v60  ;;  %v87_v5 = vld [vmem:[#allocation4 + $0xb0] sm:$0xff]  ;;  %v258_v6 = vld [vmem:[#allocation7 + $0xa0] sm:$0xff]  ;;  %v100_v56 = vshrl.u32 %v99_v55, 7 }
  0x36   :  { %1074 = vmatpush1.bf16.msra.mxu0 %v1073_v50  ;;  %v1573_v7 = vpack.c.bf16 %v261_v63, %v259_v62  ;;  %v260_v8 = vld [vmem:[#allocation7 + $0xb0] sm:$0xff]  ;;  %v90_v9 = vld [vmem:[#allocation4 + $0xc8] sm:$0xff]  ;;  %v92_v11 = vld [vmem:[#allocation4 + $0xd8] sm:$0xff]  ;;  %v1081_v15 = vpack.c.bf16 %v87_v5, %v85_v4 }
  0x37   :  { %1076 = vmatprep.subr.bf16.mxu0 %v1075_v54  ;;  %v263_v12 = vld [vmem:[#allocation7 + $0xc8] sm:$0xff]  ;;  %v265_v13 = vld [vmem:[#allocation7 + $0xd8] sm:$0xff]  ;;  %v89_v16 = vld [vmem:[#allocation4 + $0xc0] sm:$0xff]  ;;  %v1576_v17 = vpack.c.bf16 %v260_v8, %v258_v6  ;;  %v1083_v18 = vpack.c.bf16 %v92_v11, %v90_v9  ;;  %v101_v57 = vsub.s32 0, %v100_v56  ;;  %v105_v9 = vsub.s32 1, %v100_v56 }
  0x38   :  { %1106 = vmatpush1.bf16.msra.mxu1 %v1564_v53  ;;  %v91_v19 = vld [vmem:[#allocation4 + $0xd0] sm:$0xff]  ;;  %v262_v20 = vld [vmem:[#allocation7 + $0xc0] sm:$0xff]  ;;  %v1582_v22 = vpack.c.bf16 %v265_v13, %v263_v12  ;;  %v94_v25 = vld [vmem:[#allocation4 + $0xe8] sm:$0xff] }
  0x39   :  { %1108 = vmatprep.subr.bf16.mxu1 %v1567_v58  ;;  %v271_v21 = vld [vmem:[%s1849_s1] sm:$0xff]  ;;  %v264_v24 = vld [vmem:[#allocation7 + $0xd0] sm:$0xff]  ;;  %v96_v26 = vld [vmem:[#allocation4 + $0xf8] sm:$0xff]  ;;  %v1085_v31 = vpack.c.bf16 %v91_v19, %v89_v16 }
  0x3a   :  { %1078 = vmatpush1.bf16.msra.mxu0 %v1077_v1  ;;  %373 = vperm.xlu0 %1354, %v271_v21   ;;  %v267_v28 = vld [vmem:[#allocation7 + $0xe8] sm:$0xff]  ;;  %v269_v29 = vld [vmem:[#allocation7 + $0xf8] sm:$0xff]  ;;  %v1588_v32 = vpack.c.bf16 %v264_v24, %v262_v20  ;;  %v1087_v33 = vpack.c.bf16 %v96_v26, %v94_v25  ;;  %v93_v34 = vld [vmem:[#allocation4 + $0xe0] sm:$0xff] }
  0x3b   :  { %1080 = vmatprep.subr.bf16.mxu0 %v1079_v3  ;;  %v272_v30 = vld [vmem:[%s1849_s1 + $0x8] sm:$0xff]  ;;  %v95_v35 = vld [vmem:[#allocation4 + $0xf0] sm:$0xff]  ;;  %v1591_v37 = vpack.c.bf16 %v269_v29, %v267_v28  ;;  %v266_v38 = vld [vmem:[#allocation7 + $0xe0] sm:$0xff] }
  0x3c   :  { %1110 = vmatpush1.bf16.msra.mxu1 %v1570_v2  ;;  %v268_v39 = vld [vmem:[#allocation7 + $0xf0] sm:$0xff]  ;;  %v275_v41 = vld [vmem:[%s1849_s1 + $0x20] sm:$0xff]  ;;  %v1089_v42 = vpack.c.bf16 %v95_v35, %v93_v34  ;;  %v58_v47 = vld [vmem:[%s1848_s0 + $0x8] sm:$0xff] }
  0x3d   :  { %1112 = vmatprep.subr.bf16.mxu1 %v1573_v7  ;;  %v1597_v43 = vpack.c.bf16 %v268_v39, %v266_v38  ;;  %v277_v44 = vld [vmem:[%s1849_s1 + $0x30] sm:$0xff]  ;;  %v57_v46 = vld [vmem:[%s1848_s0] sm:$0xff]  ;;  %v60_v49 = vld [vmem:[%s1848_s0 + $0x18] sm:$0xff] }
  0x3e   :  { %1082 = vmatpush1.bf16.msra.mxu0 %v1081_v15  ;;  %466 = vperm.xlu0 %1354, %v272_v30   ;;  %v59_v48 = vld [vmem:[%s1848_s0 + $0x10] sm:$0xff]  ;;  %v61_v50 = vld [vmem:[%s1848_s0 + $0x20] sm:$0xff]  ;;  %v62_v51 = vld [vmem:[%s1848_s0 + $0x28] sm:$0xff] }
  0x3f   :  { %1084 = vmatprep.subr.bf16.mxu0 %v1083_v18  ;;  %v63_v52 = vld [vmem:[%s1848_s0 + $0x30] sm:$0xff]  ;;  %v64_v54 = vld [vmem:[%s1848_s0 + $0x38] sm:$0xff]  ;;  %v97_v59 = vld [vmem:[%s1851_s3] sm:$0x3] }
  0x40   :  { %1114 = vmatpush1.bf16.msra.mxu1 %v1576_v17  ;;  %v1675_v60 = vrot.slane %v97_v59, %v101_v57  ;;  %v1681_v11 = vld [vmem:[%s1853_s5] ss:$0 sm:$0xff]  ;;  %v1683_v12 = vrot.slane %v97_v59, %v105_v9 }
  0x41   :  { %1116 = vmatprep.subr.bf16.mxu1 %v1582_v22 }
  0x42   :  { %1086 = vmatpush1.bf16.msra.mxu0 %v1085_v31  ;;  %745 = vperm.xlu0 %1354, %v275_v41  }
  0x43   :  { %1088 = vmatprep.subr.bf16.mxu0 %v1087_v33 }
  0x44   :  { %1118 = vmatpush1.bf16.msra.mxu1 %v1588_v32 }
  0x45   :  { %1120 = vmatprep.subr.bf16.mxu1 %v1591_v37 }
  0x46   :  { %1090 = vmatpush1.bf16.msra.mxu0 %v1089_v42  ;;  %931 = vperm.xlu0 %1354, %v277_v44  }
  0x47   :  { %1124 = vmatprep.subr.bf16.mxu0 %v1544_v10 }
  0x48   :  { %1122 = vmatpush1.bf16.msra.mxu1 %v1597_v43 }
  0x49   :  { %1156 = vmatprep.subr.bf16.mxu1 %v1544_v10  ;;  %174 = vmatmul.mubr.f32.vlgmr.msra.gmra.mrb[0].mxu0 %v57_v46  ;;  %v273_v46 = vld [vmem:[%s1849_s1 + $0x10] sm:$0xff] }
  0x4a   :  { %1126 = vmatpush1.bf16.msra.mxu0 %v1546_v14  ;;  %179 = vmatprep.mubr.f32.mxu0 %v1480_v0 }
  0x4b   :  { %347 = vmatmul.mubr.f32.vlgmr.msra.gmra.mrb[0].mxu1 %v1480_v0  ;;  %1128 = vmatprep.subr.bf16.mxu0 %v1550_v23 }
  0x4c   :  { %1158 = vmatpush1.bf16.msra.mxu1 %v1546_v14  ;;  %538 = vmatprep.mubr.f32.mxu1 %v1480_v0 }
  0x4d   :  { %1160 = vmatprep.subr.bf16.mxu1 %v1550_v23  ;;  %180 = vmatmul.mubr.f32.gmra.mrb[2].mxu0 %v58_v47  ;;  %v274_v47 = vld [vmem:[%s1849_s1 + $0x18] sm:$0xff] }
  0x4e   :  { %1130 = vmatpush1.bf16.msra.mxu0 %v1552_v27  ;;  %185 = vmatprep.mubr.f32.mxu0 %v1480_v0 }
  0x4f   :  { %1132 = vmatprep.subr.bf16.mxu0 %v1555_v36  ;;  %559 = vperm.xlu1 %1355, %v273_v46  }
  0x50   :  { %1162 = vmatpush1.bf16.msra.mxu1 %v1552_v27 }
  0x51   :  { %1164 = vmatprep.subr.bf16.mxu1 %v1555_v36  ;;  %186 = vmatmul.mubr.f32.gmra.mrb[4].mxu0 %v59_v48  ;;  %v276_v48 = vld [vmem:[%s1849_s1 + $0x28] sm:$0xff] }
  0x52   :  { %1134 = vmatpush1.bf16.msra.mxu0 %v1558_v40  ;;  %191 = vmatprep.mubr.f32.mxu0 %v1480_v0 }
  0x53   :  { %1136 = vmatprep.subr.bf16.mxu0 %v1561_v45  ;;  %652 = vperm.xlu1 %1355, %v274_v47  }
  0x54   :  { %1166 = vmatpush1.bf16.msra.mxu1 %v1558_v40 }
  0x55   :  { %1168 = vmatprep.subr.bf16.mxu1 %v1561_v45  ;;  %192 = vmatmul.mubr.f32.gmra.mrb[6].mxu0 %v60_v49  ;;  %v278_v49 = vld [vmem:[%s1849_s1 + $0x38] sm:$0xff]  ;;  %s1482_s1 = smov [#allocation9]  }
  0x56   :  { %1138 = vmatpush1.bf16.msra.mxu0 %v1564_v53  ;;  %197 = vmatprep.mubr.f32.mxu0 %v1480_v0  ;;  %s1040_s28 = sshll.u32 %s1482_s1, 4  ;;  %s1041_s28 = int_to_ptr.vmem [resolvable:$true] %s1040_s28 }
  0x57   :  { %1140 = vmatprep.subr.bf16.mxu0 %v1567_v58  ;;  %838 = vperm.xlu1 %1355, %v276_v48   ;;  %s1448_s29 = scalar_lea.vmem %s1041_s28, 128  ;;  %p1453_p3 = scmp.lt.s32.totalorder %s1041_s28, %s1041_s28 }
  0x58   :  { %1170 = vmatpush1.bf16.msra.mxu1 %v1564_v53  ;;  %p1449_p2 = scmp.ne.s32.totalorder %s1041_s28, %s1448_s29  ;;  %p1454_p4 = scmp.lt.s32.totalorder %s1448_s29, %s1448_s29 }
  0x59   :  { %1172 = vmatprep.subr.bf16.mxu1 %v1567_v58  ;;  %198 = vmatmul.mubr.f32.gmra.mrb[8].mxu0 %v61_v50 }
  0x5a   :  { %1142 = vmatpush1.bf16.msra.mxu0 %v1570_v2  ;;  %203 = vmatprep.mubr.f32.mxu0 %v1480_v0  ;;  %p1455_p5 = por %p1454_p4, %p1453_p3 }
  0x5b   :  { %1144 = vmatprep.subr.bf16.mxu0 %v1573_v7  ;;  %1024 = vperm.xlu1 %1355, %v278_v49  }
  0x5c   :  { %1174 = vmatpush1.bf16.msra.mxu1 %v1570_v2  ;;  %p1456_p6 = pnand %p1455_p5, %p1449_p2 }
  0x5d   :  { %1176 = vmatprep.subr.bf16.mxu1 %v1573_v7  ;;  %204 = vmatmul.mubr.f32.gmra.mrb[10].mxu0 %v62_v51 }
  0x5e   :  { %1146 = vmatpush1.bf16.msra.mxu0 %v1576_v17  ;;  %209 = vmatprep.mubr.f32.mxu0 %v1480_v0 }
  0x5f   :  { %1148 = vmatprep.subr.bf16.mxu0 %v1582_v22 }
  0x60   :  { %1178 = vmatpush1.bf16.msra.mxu1 %v1576_v17 }
  0x61   :  { %1180 = vmatprep.subr.bf16.mxu1 %v1582_v22  ;;  %210 = vmatmul.mubr.f32.gmra.mrb[12].mxu0 %v63_v52 }
  0x62   :  { %1150 = vmatpush1.bf16.msra.mxu0 %v1588_v32  ;;  %215 = vmatprep.mubr.f32.mxu0 %v1480_v0 }
  0x63   :  { %1152 = vmatprep.subr.bf16.mxu0 %v1591_v37 }
  0x64   :  { %1182 = vmatpush1.bf16.msra.mxu1 %v1588_v32 }
  0x65   :  { %1184 = vmatprep.subr.bf16.mxu1 %v1591_v37  ;;  %216 = vmatmul.mubr.f32.gmra.mrb[14].mxu0 %v64_v54 }
  0x66   :  { %1154 = vmatpush1.bf16.msra.mxu0 %v1597_v43  ;;  %445 = vmatprep.mubr.f32.mxu0 %v1480_v0 }
  0x67   :  { %1188 = vmatprep.subr.bf16.mxu0 %v1544_v10 }
  0x68   :  { %1186 = vmatpush1.bf16.msra.mxu1 %v1597_v43 }
  0x69   :  { %1220 = vmatprep.subr.bf16.mxu1 %v1544_v10 }
  0xb9   :  { %v374_v21 = vpop.permute.xlu0 %373 }
 0x11c   :  { %v175_v61 = vpop.f32.mrb[0].mxu0 }
 0x11d   :  { %v176_v62 = vadd.f32 %v175_v61, %v1675_v60  ;;  %v177_v63 = vpop.f32.mrb[1].mxu0 }
 0x11e   :  { %v348_v1 = vpop.f32.mrb[0].mxu1  ;;  %v178_v16 = vadd.f32 %v177_v63, %v1683_v12 }
 0x11f   :  { %v350_v3 = vpop.f32.mrb[1].mxu1  ;;  %v353_v4 = vadd.f32 %v348_v1, %v176_v62 }
 0x120   :  { %v366_v13 = vadd.f32 %v1681_v11, %v350_v3  ;;  %v181_v25 = vpop.f32.mrb[2].mxu0 }
 0x121   :  { %v1050_v5 = vmul.f32 -1.442695, %v353_v4  ;;  %v183_v26 = vpop.f32.mrb[3].mxu0  ;;  %v182_v50 = vadd.f32 %v181_v25, %v1675_v60 }
 0x122   :  { %v184_v62 = vadd.f32 %v183_v26, %v1683_v12 }
 0x123   :  { %1356 = vpow2.f32 %v1050_v5  ;;  %v467_v5 = vpop.permute.xlu0 %466 }
 0x124   :  { %v187_v28 = vpop.f32.mrb[4].mxu0 }
 0x125   :  { %v1704_v29 = vpop.f32.mrb[5].mxu0  ;;  %v188_v9 = vadd.f32 %v187_v28, %v1675_v60  ;;  %v560_v28 = vpop.permute.xlu1 %559 }
 0x126   :  { %v190_v25 = vadd.f32 %v1704_v29, %v1683_v12 }
 0x128   :  { %v1706_v30 = vpop.f32.mrb[6].mxu0 }
 0x129   :  { %v1708_v31 = vpop.f32.mrb[7].mxu0  ;;  %v194_v29 = vadd.f32 %v1706_v30, %v1675_v60  ;;  %v653_v30 = vpop.permute.xlu1 %652 }
 0x12c   :  { %v1710_v33 = vpop.f32.mrb[8].mxu0 }
 0x12d   :  { %v1357_v6 = vpop.eup %1356  ;;  %v1712_v34 = vpop.f32.mrb[9].mxu0 }
 0x12e   :  { %v357_v8 = vadd.f32 1.0, %v1357_v6 }
 0x130   :  { %1358 = vrcp.f32 %v357_v8  ;;  %v1714_v35 = vpop.f32.mrb[10].mxu0 }
 0x131   :  { %v1716_v38 = vpop.f32.mrb[11].mxu0 }
 0x134   :  { %v1718_v39 = vpop.f32.mrb[12].mxu0 }
 0x135   :  { %v1720_v41 = vpop.f32.mrb[13].mxu0 }
 0x138   :  { %v1722_v42 = vpop.f32.mrb[14].mxu0 }
 0x139   :  { %v1724_v44 = vpop.f32.mrb[15].mxu0 }
 0x13a   :  { %v1359_v15 = vpop.eup %1358 }
 0x13b   :  { %v367_v18 = vmul.f32 %v1359_v15, %v366_v13 }
 0x13d   :  { %v368_v19 = vadd.f32 %v367_v18, %v178_v16 }
 0x13f   :  { %1360 = vtanh.f32 %v368_v19 }
 0x149   :  { %v1361_v20 = vpop.eup %1360 }
 0x14a   :  { %v376_v24 = vmul.f32 %v1361_v20, %v374_v21 }
 0x14c   :  { %446 = vmatmul.mubr.f32.vlgmr.msra.gmra.mrb[16].mxu0 %v376_v24 }
 0x14d   :  { %1190 = vmatpush1.bf16.msra.mxu0 %v1546_v14  ;;  %631 = vmatprep.mubr.f32.mxu0 %v1480_v0 }
 0x14e   :  { %1192 = vmatprep.subr.bf16.mxu0 %v1550_v23 }
 0x151   :  { %1194 = vmatpush1.bf16.msra.mxu0 %v1552_v27 }
 0x152   :  { %1196 = vmatprep.subr.bf16.mxu0 %v1555_v36 }
 0x155   :  { %1198 = vmatpush1.bf16.msra.mxu0 %v1558_v40 }
 0x156   :  { %1200 = vmatprep.subr.bf16.mxu0 %v1561_v45 }
 0x159   :  { %1202 = vmatpush1.bf16.msra.mxu0 %v1564_v53 }
 0x15a   :  { %1204 = vmatprep.subr.bf16.mxu0 %v1567_v58 }
 0x15d   :  { %1206 = vmatpush1.bf16.msra.mxu0 %v1570_v2 }
 0x15e   :  { %1208 = vmatprep.subr.bf16.mxu0 %v1573_v7 }
 0x161   :  { %1210 = vmatpush1.bf16.msra.mxu0 %v1576_v17 }
 0x162   :  { %1212 = vmatprep.subr.bf16.mxu0 %v1582_v22 }
 0x165   :  { %1214 = vmatpush1.bf16.msra.mxu0 %v1588_v32 }
 0x166   :  { %1216 = vmatprep.subr.bf16.mxu0 %v1591_v37 }
 0x169   :  { %1218 = vmatpush1.bf16.msra.mxu0 %v1597_v43 }
 0x16a   :  { %1252 = vmatprep.subr.bf16.mxu0 %v1544_v10 }
 0x21f   :  { %v447_v51 = vpop.f32.mrb[16].mxu0 }
 0x220   :  { %v452_v52 = vadd.f32 %v447_v51, %v182_v50  ;;  %v449_v54 = vpop.f32.mrb[17].mxu0 }
 0x221   :  { %v459_v59 = vadd.f32 %v1681_v11, %v449_v54 }
 0x222   :  { %v1052_v55 = vmul.f32 -1.442695, %v452_v52 }
 0x224   :  { %1362 = vpow2.f32 %v1052_v55 }
 0x22e   :  { %v1363_v56 = vpop.eup %1362 }
 0x22f   :  { %v456_v57 = vadd.f32 1.0, %v1363_v56 }
 0x231   :  { %1364 = vrcp.f32 %v456_v57 }
 0x23b   :  { %v1365_v61 = vpop.eup %1364 }
 0x23c   :  { %v460_v63 = vmul.f32 %v1365_v61, %v459_v59 }
 0x23e   :  { %v461_v1 = vadd.f32 %v460_v63, %v184_v62  ;;  %v196_v62 = vadd.f32 %v1708_v31, %v1683_v12  ;;  %v200_v31 = vadd.f32 %v1710_v33, %v1675_v60  ;;  %v746_v33 = vpop.permute.xlu0 %745 }
 0x240   :  { %1366 = vtanh.f32 %v461_v1 }
 0x24a   :  { %v1367_v3 = vpop.eup %1366 }
 0x24b   :  { %v463_v4 = vsub.f32 %v1367_v3, %v376_v24 }
 0x24d   :  { %v469_v6 = vmul.f32 %v467_v5, %v463_v4 }
 0x24f   :  { %v470_v8 = vadd.f32 %v469_v6, %v376_v24 }
 0x251   :  { %539 = vmatmul.mubr.f32.vlgmr.msra.gmra.mrb[2].mxu1 %v470_v8 }
 0x252   :  { %1222 = vmatpush1.bf16.msra.mxu1 %v1546_v14  ;;  %724 = vmatprep.mubr.f32.mxu1 %v1480_v0 }
 0x253   :  { %1224 = vmatprep.subr.bf16.mxu1 %v1550_v23 }
 0x256   :  { %1226 = vmatpush1.bf16.msra.mxu1 %v1552_v27 }
 0x257   :  { %1228 = vmatprep.subr.bf16.mxu1 %v1555_v36 }
 0x25a   :  { %1230 = vmatpush1.bf16.msra.mxu1 %v1558_v40 }
 0x25b   :  { %1232 = vmatprep.subr.bf16.mxu1 %v1561_v45 }
 0x25e   :  { %1234 = vmatpush1.bf16.msra.mxu1 %v1564_v53 }
 0x25f   :  { %1236 = vmatprep.subr.bf16.mxu1 %v1567_v58 }
 0x262   :  { %1238 = vmatpush1.bf16.msra.mxu1 %v1570_v2 }
 0x263   :  { %1240 = vmatprep.subr.bf16.mxu1 %v1573_v7 }
 0x266   :  { %1242 = vmatpush1.bf16.msra.mxu1 %v1576_v17 }
 0x267   :  { %1244 = vmatprep.subr.bf16.mxu1 %v1582_v22 }
 0x26a   :  { %1246 = vmatpush1.bf16.msra.mxu1 %v1588_v32 }
 0x26b   :  { %1248 = vmatprep.subr.bf16.mxu1 %v1591_v37 }
 0x26e   :  { %1250 = vmatpush1.bf16.msra.mxu1 %v1597_v43 }
 0x26f   :  { %1284 = vmatprep.subr.bf16.mxu1 %v1544_v10 }
 0x324   :  { %v540_v13 = vpop.f32.mrb[2].mxu1 }
 0x325   :  { %v545_v15 = vadd.f32 %v540_v13, %v188_v9  ;;  %v542_v16 = vpop.f32.mrb[3].mxu1 }
 0x326   :  { %v552_v21 = vadd.f32 %v1681_v11, %v542_v16 }
 0x327   :  { %v1053_v18 = vmul.f32 -1.442695, %v545_v15 }
 0x329   :  { %1368 = vpow2.f32 %v1053_v18 }
 0x333   :  { %v1369_v19 = vpop.eup %1368 }
 0x334   :  { %v549_v20 = vadd.f32 1.0, %v1369_v19 }
 0x336   :  { %1370 = vrcp.f32 %v549_v20  ;;  %v202_v20 = vadd.f32 %v1712_v34, %v1683_v12 }
 0x340   :  { %v1371_v24 = vpop.eup %1370 }
 0x341   :  { %v553_v26 = vmul.f32 %v1371_v24, %v552_v21 }
 0x343   :  { %v554_v46 = vadd.f32 %v553_v26, %v190_v25 }
 0x345   :  { %1372 = vtanh.f32 %v554_v46 }
 0x34f   :  { %v1373_v47 = vpop.eup %1372 }
 0x350   :  { %v556_v48 = vsub.f32 %v1373_v47, %v470_v8 }
 0x352   :  { %v562_v49 = vmul.f32 %v560_v28, %v556_v48 }
 0x354   :  { %v563_v50 = vadd.f32 %v562_v49, %v470_v8 }
 0x356   :  { %632 = vmatmul.mubr.f32.vlgmr.msra.gmra.mrb[18].mxu0 %v563_v50 }
 0x357   :  { %1254 = vmatpush1.bf16.msra.mxu0 %v1546_v14  ;;  %817 = vmatprep.mubr.f32.mxu0 %v1480_v0 }
 0x358   :  { %1256 = vmatprep.subr.bf16.mxu0 %v1550_v23 }
 0x35b   :  { %1258 = vmatpush1.bf16.msra.mxu0 %v1552_v27 }
 0x35c   :  { %1260 = vmatprep.subr.bf16.mxu0 %v1555_v36 }
 0x35f   :  { %1262 = vmatpush1.bf16.msra.mxu0 %v1558_v40 }
 0x360   :  { %1264 = vmatprep.subr.bf16.mxu0 %v1561_v45 }
 0x363   :  { %1266 = vmatpush1.bf16.msra.mxu0 %v1564_v53 }
 0x364   :  { %1268 = vmatprep.subr.bf16.mxu0 %v1567_v58 }
 0x367   :  { %1270 = vmatpush1.bf16.msra.mxu0 %v1570_v2 }
 0x368   :  { %1272 = vmatprep.subr.bf16.mxu0 %v1573_v7 }
 0x36b   :  { %1274 = vmatpush1.bf16.msra.mxu0 %v1576_v17 }
 0x36c   :  { %1276 = vmatprep.subr.bf16.mxu0 %v1582_v22 }
 0x36f   :  { %1278 = vmatpush1.bf16.msra.mxu0 %v1588_v32 }
 0x370   :  { %1280 = vmatprep.subr.bf16.mxu0 %v1591_v37 }
 0x373   :  { %1282 = vmatpush1.bf16.msra.mxu0 %v1597_v43 }
 0x374   :  { %1316 = vmatprep.subr.bf16.mxu0 %v1544_v10 }
 0x429   :  { %v633_v51 = vpop.f32.mrb[18].mxu0 }
 0x42a   :  { %v638_v52 = vadd.f32 %v633_v51, %v194_v29  ;;  %v635_v54 = vpop.f32.mrb[19].mxu0 }
 0x42b   :  { %v645_v59 = vadd.f32 %v1681_v11, %v635_v54  ;;  %v214_v54 = vadd.f32 %v1720_v41, %v1683_v12 }
 0x42c   :  { %v1054_v55 = vmul.f32 -1.442695, %v638_v52 }
 0x42e   :  { %1374 = vpow2.f32 %v1054_v55 }
 0x438   :  { %v1375_v56 = vpop.eup %1374 }
 0x439   :  { %v642_v57 = vadd.f32 1.0, %v1375_v56 }
 0x43b   :  { %1376 = vrcp.f32 %v642_v57 }
 0x445   :  { %v1377_v61 = vpop.eup %1376 }
 0x446   :  { %v646_v63 = vmul.f32 %v1377_v61, %v645_v59 }
 0x448   :  { %v647_v1 = vadd.f32 %v646_v63, %v196_v62  ;;  %v218_v63 = vadd.f32 %v1722_v42, %v1675_v60 }
 0x44a   :  { %1378 = vtanh.f32 %v647_v1 }
 0x454   :  { %v1379_v10 = vpop.eup %1378 }
 0x455   :  { %v649_v3 = vsub.f32 %v1379_v10, %v563_v50 }
 0x457   :  { %v655_v4 = vmul.f32 %v653_v30, %v649_v3 }
 0x459   :  { %v656_v5 = vadd.f32 %v655_v4, %v563_v50 }
 0x45b   :  { %725 = vmatmul.mubr.f32.vlgmr.msra.gmra.mrb[4].mxu1 %v656_v5 }
 0x45c   :  { %1286 = vmatpush1.bf16.msra.mxu1 %v1546_v14  ;;  %910 = vmatprep.mubr.f32.mxu1 %v1480_v0 }
 0x45d   :  { %1288 = vmatprep.subr.bf16.mxu1 %v1550_v23 }
 0x460   :  { %1290 = vmatpush1.bf16.msra.mxu1 %v1552_v27 }
 0x461   :  { %1292 = vmatprep.subr.bf16.mxu1 %v1555_v36 }
 0x464   :  { %1294 = vmatpush1.bf16.msra.mxu1 %v1558_v40 }
 0x465   :  { %1296 = vmatprep.subr.bf16.mxu1 %v1561_v45 }
 0x468   :  { %1298 = vmatpush1.bf16.msra.mxu1 %v1564_v53 }
 0x469   :  { %1300 = vmatprep.subr.bf16.mxu1 %v1567_v58 }
 0x46c   :  { %1302 = vmatpush1.bf16.msra.mxu1 %v1570_v2 }
 0x46d   :  { %1304 = vmatprep.subr.bf16.mxu1 %v1573_v7 }
 0x470   :  { %1306 = vmatpush1.bf16.msra.mxu1 %v1576_v17 }
 0x471   :  { %1308 = vmatprep.subr.bf16.mxu1 %v1582_v22 }
 0x474   :  { %1310 = vmatpush1.bf16.msra.mxu1 %v1588_v32 }
 0x475   :  { %1312 = vmatprep.subr.bf16.mxu1 %v1591_v37 }
 0x478   :  { %1314 = vmatpush1.bf16.msra.mxu1 %v1597_v43 }
 0x52e   :  { %v726_v6 = vpop.f32.mrb[4].mxu1 }
 0x52f   :  { %v731_v8 = vadd.f32 %v726_v6, %v200_v31  ;;  %v728_v9 = vpop.f32.mrb[5].mxu1  ;;  %v220_v6 = vadd.f32 %v1724_v44, %v1683_v12 }
 0x530   :  { %v738_v18 = vadd.f32 %v1681_v11, %v728_v9 }
 0x531   :  { %v1055_v13 = vmul.f32 -1.442695, %v731_v8 }
 0x533   :  { %1380 = vpow2.f32 %v1055_v13 }
 0x53d   :  { %v1381_v15 = vpop.eup %1380 }
 0x53e   :  { %v735_v16 = vadd.f32 1.0, %v1381_v15 }
 0x540   :  { %1382 = vrcp.f32 %v735_v16 }
 0x54a   :  { %v1383_v19 = vpop.eup %1382 }
 0x54b   :  { %v739_v21 = vmul.f32 %v1383_v19, %v738_v18 }
 0x54d   :  { %v740_v24 = vadd.f32 %v739_v21, %v202_v20 }
 0x54f   :  { %1384 = vtanh.f32 %v740_v24 }
 0x559   :  { %v1385_v25 = vpop.eup %1384 }
 0x55a   :  { %v742_v26 = vsub.f32 %v1385_v25, %v656_v5 }
 0x55c   :  { %v748_v46 = vmul.f32 %v746_v33, %v742_v26 }
 0x55e   :  { %v749_v47 = vadd.f32 %v748_v46, %v656_v5 }
 0x560   :  { %818 = vmatmul.mubr.f32.vlgmr.msra.gmra.mrb[20].mxu0 %v749_v47 }
 0x561   :  { %1318 = vmatpush1.bf16.msra.mxu0 %v1546_v14  ;;  %1003 = vmatprep.mubr.f32.mxu0 %v1480_v0  ;;  %v206_v0 = vadd.f32 %v1714_v35, %v1675_v60  ;;  %v212_v35 = vadd.f32 %v1718_v39, %v1675_v60  ;;  %v932_v39 = vpop.permute.xlu0 %931 }
 0x562   :  { %1320 = vmatprep.subr.bf16.mxu0 %v1550_v23 }
 0x565   :  { %1322 = vmatpush1.bf16.msra.mxu0 %v1552_v27 }
 0x566   :  { %1324 = vmatprep.subr.bf16.mxu0 %v1555_v36 }
 0x569   :  { %1326 = vmatpush1.bf16.msra.mxu0 %v1558_v40 }
 0x56a   :  { %1328 = vmatprep.subr.bf16.mxu0 %v1561_v45 }
 0x56d   :  { %1330 = vmatpush1.bf16.msra.mxu0 %v1564_v53 }
 0x56e   :  { %1332 = vmatprep.subr.bf16.mxu0 %v1567_v58 }
 0x571   :  { %1334 = vmatpush1.bf16.msra.mxu0 %v1570_v2  ;;  %v208_v2 = vadd.f32 %v1716_v38, %v1683_v12 }
 0x572   :  { %1336 = vmatprep.subr.bf16.mxu0 %v1573_v7 }
 0x575   :  { %1338 = vmatpush1.bf16.msra.mxu0 %v1576_v17 }
 0x576   :  { %1340 = vmatprep.subr.bf16.mxu0 %v1582_v22 }
 0x579   :  { %1342 = vmatpush1.bf16.msra.mxu0 %v1588_v32 }
 0x57a   :  { %1344 = vmatprep.subr.bf16.mxu0 %v1591_v37  ;;  %v839_v37 = vpop.permute.xlu1 %838 }
 0x57d   :  { %1346 = vmatpush1.bf16.msra.mxu0 %v1597_v43 }
 0x57e   :  { %v1025_v60 = vpop.permute.xlu1 %1024 }
 0x633   :  { %v819_v14 = vpop.f32.mrb[20].mxu0 }
 0x634   :  { %v824_v23 = vadd.f32 %v819_v14, %v206_v0  ;;  %v821_v27 = vpop.f32.mrb[21].mxu0 }
 0x635   :  { %v831_v53 = vadd.f32 %v1681_v11, %v821_v27 }
 0x636   :  { %v1056_v36 = vmul.f32 -1.442695, %v824_v23 }
 0x638   :  { %1386 = vpow2.f32 %v1056_v36 }
 0x642   :  { %v1387_v40 = vpop.eup %1386 }
 0x643   :  { %v828_v45 = vadd.f32 1.0, %v1387_v40 }
 0x645   :  { %1388 = vrcp.f32 %v828_v45 }
 0x64f   :  { %v1389_v58 = vpop.eup %1388 }
 0x650   :  { %v832_v7 = vmul.f32 %v1389_v58, %v831_v53 }
 0x652   :  { %v833_v17 = vadd.f32 %v832_v7, %v208_v2 }
 0x654   :  { %1390 = vtanh.f32 %v833_v17 }
 0x65e   :  { %v1391_v22 = vpop.eup %1390 }
 0x65f   :  { %v835_v32 = vsub.f32 %v1391_v22, %v749_v47 }
 0x661   :  { %v841_v43 = vmul.f32 %v839_v37, %v835_v32 }
 0x663   :  { %v842_v34 = vadd.f32 %v841_v43, %v749_v47 }
 0x665   :  { %911 = vmatmul.mubr.f32.vlgmr.msra.gmra.mrb[6].mxu1 %v842_v34 }
 0x738   :  { %v912_v48 = vpop.f32.mrb[6].mxu1 }
 0x739   :  { %v917_v28 = vadd.f32 %v912_v48, %v212_v35  ;;  %v914_v49 = vpop.f32.mrb[7].mxu1 }
 0x73a   :  { %v924_v38 = vadd.f32 %v1681_v11, %v914_v49 }
 0x73b   :  { %v1057_v50 = vmul.f32 -1.442695, %v917_v28 }
 0x73d   :  { %1392 = vpow2.f32 %v1057_v50 }
 0x747   :  { %v1393_v29 = vpop.eup %1392 }
 0x748   :  { %v921_v51 = vadd.f32 1.0, %v1393_v29 }
 0x74a   :  { %1394 = vrcp.f32 %v921_v51 }
 0x754   :  { %v1395_v52 = vpop.eup %1394 }
 0x755   :  { %v925_v55 = vmul.f32 %v1395_v52, %v924_v38 }
 0x757   :  { %v926_v56 = vadd.f32 %v925_v55, %v214_v54 }
 0x759   :  { %1396 = vtanh.f32 %v926_v56 }
 0x763   :  { %v1397_v57 = vpop.eup %1396 }
 0x764   :  { %v928_v59 = vsub.f32 %v1397_v57, %v842_v34 }
 0x766   :  { %v934_v61 = vmul.f32 %v932_v39, %v928_v59 }
 0x768   :  { %v935_v62 = vadd.f32 %v934_v61, %v842_v34 }
 0x76a   :  { %1004 = vmatmul.mubr.f32.vlgmr.msra.gmra.mrb[22].mxu0 %v935_v62 }
 0x83d   :  { %v1005_v1 = vpop.f32.mrb[22].mxu0 }
 0x83e   :  { %v1010_v10 = vadd.f32 %v1005_v1, %v218_v63  ;;  %v1007_v3 = vpop.f32.mrb[23].mxu0 }
 0x83f   :  { %v1017_v41 = vadd.f32 %v1681_v11, %v1007_v3 }
 0x840   :  { %v1058_v30 = vmul.f32 -1.442695, %v1010_v10 }
 0x842   :  { %1398 = vpow2.f32 %v1058_v30 }
 0x84c   :  { %v1399_v4 = vpop.eup %1398 }
 0x84d   :  { %v1014_v5 = vadd.f32 1.0, %v1399_v4 }
 0x84f   :  { %1400 = vrcp.f32 %v1014_v5 }
 0x859   :  { %v1401_v31 = vpop.eup %1400 }
 0x85a   :  { %v1018_v8 = vmul.f32 %v1401_v31, %v1017_v41 }
 0x85c   :  { %v1019_v9 = vadd.f32 %v1018_v8, %v220_v6 }
 0x85e   :  { %1402 = vtanh.f32 %v1019_v9 }
 0x868   :  { %v1403_v13 = vpop.eup %1402 }
 0x869   :  { %v1021_v15 = vsub.f32 %v1403_v13, %v935_v62 }
 0x86b   :  { %v1027_v42 = vmul.f32 %v1025_v60, %v1021_v15 }
 0x86d   :  { %v1028_v16 = vadd.f32 %v1027_v42, %v935_v62 }
 0x86f   :  { %1033 = vst [vmem:[#allocation9] sm:$0xff] %v1028_v16 }
 0x870   :  { %1459 = shalt.err (!%p1456_p6)
}
 0x871   :  { %s1460_s8 = scalar_lea.hbm %s1854_s6, 128 }
 0x872   :  { %p1461_p7 = scmp.ne.s32.totalorder %s1854_s6, %s1460_s8  ;;  %p1464_p8 = scmp.lt.u32.totalorder %s1460_s8, %s1854_s6 }
 0x874   :  { %p1466_p9 = pnand %p1464_p8, %p1461_p7 }
 0x876   :  { %1469 = shalt.err (!%p1466_p9)
}
 0x877   :  { %1043 = dma.vmem_to_hbm [thread:$0]  %s1041_s28, 128, %s1854_s6, [#allocation6]  }
 0x878   :  { %1474 = dma.done.wait [#allocation6], 128  }
 0x879   :  { %1475 = vsyncadd [#allocation6], 4294967168 }
 0x87a   :  { %1047 = vsyncpa [#allocation5], 1 }
 0x87b   :  { %1048 = vsyncpa [#allocation8], 1 }
 0x87c   :  { %1049 = vsyncpa [#allocation6], 1 }

</bundles_post_ra>
